<compile_context>
chip_gen: v6e
topology: v6e:2x2x1
jax: 0.10.0
libtpu: 0.0.40
codegen_flags: <defaults>
</compile_context>

<pallas_src>
import functools

import jax
import jax.numpy as jnp
from jax.experimental import pallas as pl
from jax.experimental.pallas import tpu as pltpu

_LANE = 128
_MiB = 1024 * 1024


def _round_up(x, m):
    return ((x + m - 1) // m) * m


def _physical_vmem_bytes():
    """Per-core VMEM capacity; conservative fallback if the query fails."""
    try:
        cap = int(getattr(pltpu.get_tpu_info(), "vmem_capacity_bytes", 0))
    except Exception:
        cap = 0
    return cap if cap > 0 else 64 * _MiB  # v7x per-TC size: safe everywhere


def _transcendental_dtype():
    """bf16 EUP path on v6e/v7x; v5e and older have no bf16 EUP/VPU."""
    try:
        kind = jax.devices()[0].device_kind.lower()
    except Exception:
        return jnp.float32
    if any(v in kind for v in ("v2", "v3", "v4", "v5")):
        return jnp.float32
    return jnp.bfloat16


def lstm_cell_kernel(x_ref, hx_ref, cx_ref, w_ih_ref, w_hh_ref, b_ref,
                     hy_ref, cy_ref, *, eup_dtype):
    Hp = cx_ref.shape[1]
    mxu_dtype = w_ih_ref.dtype

    # Two MXU pushes (same FLOPs as one fused [x|hx] push), f32 accumulation.
    gates = (
        jnp.dot(x_ref[...].astype(mxu_dtype), w_ih_ref[...],
                preferred_element_type=jnp.float32)
        + jnp.dot(hx_ref[...].astype(mxu_dtype), w_hh_ref[...],
                  preferred_element_type=jnp.float32)
        + b_ref[...]
    )

    def sig(v):  # sigmoid via tanh identity: one EUP push instead of exp+recip
        return 0.5 * jnp.tanh(0.5 * v) + 0.5

    def gate(g):  # Hp is a multiple of 128 -> lane-aligned slice, no relayout
        return gates[:, g * Hp:(g + 1) * Hp].astype(eup_dtype)

    in_gate = sig(gate(0)).astype(jnp.float32)
    forget_gate = sig(gate(1)).astype(jnp.float32)
    cell_gate = jnp.tanh(gate(2)).astype(jnp.float32)
    out_gate = sig(gate(3)).astype(jnp.float32)

    # Cell-state update kept in f32.
    cy = forget_gate * cx_ref[...].astype(jnp.float32) + in_gate * cell_gate
    hy = out_gate * jnp.tanh(cy.astype(eup_dtype)).astype(jnp.float32)

    # Two direct full-tile stores (no in-kernel concatenate).
    hy_ref[...] = hy.astype(hy_ref.dtype)
    cy_ref[...] = cy.astype(cy_ref.dtype)


def prepare_lstm_params(weight_ih, weight_hh, bias_ih, bias_hh,
                        compute_dtype=jnp.bfloat16, lane=_LANE):
    """One-time parameter prep (do this OUTSIDE the per-step path).

    Returns lane-aligned, pre-transposed weights:
      w_ih_t: (Ip, 4*Hp), w_hh_t: (Hp, 4*Hp) in compute_dtype,
      b_fused: (1, 4*Hp) f32,
    where Ip = round_up(input_size, 128), Hp = round_up(H, 128) and each gate
    occupies its own 128-aligned, zero-padded column block.
    Use compute_dtype=jnp.float32 if bit-level parity with f32 matters.
    """
    four_h, input_size = weight_ih.shape
    H = four_h // 4
    Hp = _round_up(H, lane)
    Ip = _round_up(input_size, lane)

    def pad_cols_per_gate(w_t):                      # (rows, 4H) -> (rows, 4Hp)
        rows = w_t.shape[0]
        w4 = w_t.reshape(rows, 4, H)
        w4 = jnp.pad(w4, ((0, 0), (0, 0), (0, Hp - H)))
        return w4.reshape(rows, 4 * Hp)

    w_ih_t = pad_cols_per_gate(weight_ih.T.astype(jnp.float32))
    w_ih_t = jnp.pad(w_ih_t, ((0, Ip - input_size), (0, 0))).astype(compute_dtype)
    w_hh_t = pad_cols_per_gate(weight_hh.T.astype(jnp.float32))
    w_hh_t = jnp.pad(w_hh_t, ((0, Hp - H), (0, 0))).astype(compute_dtype)

    b = bias_ih.astype(jnp.float32) + bias_hh.astype(jnp.float32)
    b_fused = jnp.pad(b.reshape(4, H), ((0, 0), (0, Hp - H))).reshape(1, 4 * Hp)
    return w_ih_t, w_hh_t, b_fused


def _estimate_vmem_bytes(tb, Ip, Hp, x_isz, hx_isz, cx_isz, hy_isz, w_isz,
                         single_buffer_weights):
    wbuf = 1 if single_buffer_weights else 2
    weights = wbuf * ((Ip + Hp) * 4 * Hp * w_isz + 4 * Hp * 4)       # W + bias
    # Activation/output tiles are double-buffered by the pipeline; cy is f32.
    tiles = 2 * tb * (Ip * x_isz + Hp * (hx_isz + cx_isz + hy_isz + 4))
    gates = tb * 4 * Hp * 4                                          # f32 acc
    return weights + tiles + gates


def _pick_batch_tiling(batch, estimate_fn, tile_budget_bytes):
    Bp = _round_up(batch, 8)        # pad odd/tiny batches to a sublane multiple
    candidates = [c for c in (512, 256, 128, 64, 32, 16, 8) if Bp % c == 0]
    tb = candidates[-1]
    for cand in candidates:         # biggest tile that fits the VMEM budget
        if estimate_fn(cand) <= tile_budget_bytes:
            tb = cand
            break
    # v7x has 2 TensorCores: keep >= 2 grid steps when possible.
    if Bp // tb == 1 and tb >= 16:
        tb //= 2
    return Bp, tb


def _pad_to(a, rows, cols, dtype=None):
    if dtype is not None and a.dtype != dtype:
        a = a.astype(dtype)
    r, c = a.shape
    if r == rows and c == cols:
        return a                    # zero-cost path for aligned shapes
    return jnp.pad(a, ((0, rows - r), (0, cols - c)))


def lstm_cell_forward(x, hx, cx, w_ih_t, w_hh_t, b_fused, *,
                      single_buffer_weights=True):
    """Pallas-backed LSTMCell.forward.

    x: (B, input_size); hx, cx: (B, H)
    w_ih_t / w_hh_t / b_fused: outputs of prepare_lstm_params.
    Returns (hy, (hy, cy)) — same contract as the PyTorch module.
    cy is returned in f32 so recurrent use never truncates the cell state.
    """
    B, input_size = x.shape
    H = hx.shape[1]
    Ip, four_hp = w_ih_t.shape
    Hp = four_hp // 4
    assert w_hh_t.shape == (Hp, four_hp) and b_fused.shape == (1, four_hp)
    assert input_size <= Ip and H <= Hp

    hy_dtype = x.dtype
    cy_dtype = jnp.float32

    # Leave headroom for Mosaic-internal scratch on top of our own buffers.
    vmem_cap = (3 * _physical_vmem_bytes()) // 4

    def est(tb):
        return _estimate_vmem_bytes(
            tb, Ip, Hp,
            x.dtype.itemsize, hx.dtype.itemsize, 4,   # cx carried as f32
            jnp.dtype(hy_dtype).itemsize, w_ih_t.dtype.itemsize,
            single_buffer_weights)

    Bp, tb = _pick_batch_tiling(B, est, vmem_cap // 2)
    grid = (Bp // tb,)

    # Zero-pad activations only when shapes are not already lane/sublane
    # aligned (no-op for aligned production shapes); dtype casts are in-kernel.
    x_p = _pad_to(x, Bp, Ip)
    hx_p = _pad_to(hx, Bp, Hp)
    cx_p = _pad_to(cx, Bp, Hp, dtype=jnp.float32)

    # Resident operands (constant index_map): never re-fetched, so a single
    # buffer is enough — halves resident weight VMEM on v7x.
    resident = ({"pipeline_mode": pl.Buffered(1)}
                if single_buffer_weights else {})

    vmem_limit = int(min(max(est(tb) + 4 * _MiB, 32 * _MiB), vmem_cap))

    kernel = functools.partial(lstm_cell_kernel,
                               eup_dtype=_transcendental_dtype())

    hy_p, cy_p = pl.pallas_call(
        kernel,
        out_shape=(jax.ShapeDtypeStruct((Bp, Hp), hy_dtype),
                   jax.ShapeDtypeStruct((Bp, Hp), cy_dtype)),
        grid=grid,
        in_specs=[
            pl.BlockSpec((tb, Ip), lambda i: (i, 0)),                    # x
            pl.BlockSpec((tb, Hp), lambda i: (i, 0)),                    # hx
            pl.BlockSpec((tb, Hp), lambda i: (i, 0)),                    # cx
            pl.BlockSpec((Ip, four_hp), lambda i: (0, 0), **resident),   # W_ih^T
            pl.BlockSpec((Hp, four_hp), lambda i: (0, 0), **resident),   # W_hh^T
            pl.BlockSpec((1, four_hp), lambda i: (0, 0), **resident),    # bias
        ],
        out_specs=(
            pl.BlockSpec((tb, Hp), lambda i: (i, 0)),                    # hy
            pl.BlockSpec((tb, Hp), lambda i: (i, 0)),                    # cy
        ),
        compiler_params=pltpu.CompilerParams(
            dimension_semantics=("parallel",),    # megacore split on v7x
            vmem_limit_bytes=vmem_limit,
        ),
    )(x_p, hx_p, cx_p, w_ih_t, w_hh_t, b_fused)

    if Bp != B or Hp != H:
        hy = hy_p[:B, :H]
        cy = cy_p[:B, :H]
    else:
        hy, cy = hy_p, cy_p
    return hy, (hy, cy)


def init_lstm_params(key, input_size, hidden_size, dtype=jnp.float32):
    """Deterministic parameter init mirroring LSTMCell.__init__ semantics."""
    k1, k2, k3, k4 = jax.random.split(key, 4)
    weight_ih = jax.random.normal(k1, (4 * hidden_size, input_size), dtype)
    weight_hh = jax.random.normal(k2, (4 * hidden_size, hidden_size), dtype)
    bias_ih = jax.random.normal(k3, (4 * hidden_size,), dtype)
    bias_hh = jax.random.normal(k4, (4 * hidden_size,), dtype)
    # __init__ zeroes / ones the forget-gate slice [H:2H]
    bias_ih = bias_ih.at[hidden_size:2 * hidden_size].set(0.0)
    bias_hh = bias_hh.at[hidden_size:2 * hidden_size].set(1.0)
    return weight_ih, weight_hh, bias_ih, bias_hh


def lstm_cell_ref(x, hx, cx, weight_ih, weight_hh, bias_ih, bias_hh):
    gates = x @ weight_ih.T + bias_ih + hx @ weight_hh.T + bias_hh
    H = hx.shape[1]
    i = jax.nn.sigmoid(gates[:, 0 * H:1 * H])
    f = jax.nn.sigmoid(gates[:, 1 * H:2 * H])
    g = jnp.tanh(gates[:, 2 * H:3 * H])
    o = jax.nn.sigmoid(gates[:, 3 * H:4 * H])
    cy = f * cx + i * g
    hy = o * jnp.tanh(cy)
    return hy, cy


if __name__ == "__main__":
    batch = 8
    input_size = 32
    hidden_size = 32

    key = jax.random.PRNGKey(0)
    kx, kh, kc, kp = jax.random.split(key, 4)

    x = jax.random.normal(kx, (batch, input_size), jnp.float32)
    hx = jax.random.normal(kh, (batch, hidden_size), jnp.float32)
    cx = jax.random.normal(kc, (batch, hidden_size), jnp.float32)

    weight_ih, weight_hh, bias_ih, bias_hh = init_lstm_params(
        kp, input_size, hidden_size)

    # One-time prep (outside the step), then jit the step itself.
    w_ih_t, w_hh_t, b_fused = prepare_lstm_params(
        weight_ih, weight_hh, bias_ih, bias_hh)

    fwd = jax.jit(lstm_cell_forward, static_argnames=("single_buffer_weights",))
    try:
        hy, (_, cy) = fwd(x, hx, cx, w_ih_t, w_hh_t, b_fused,
                          single_buffer_weights=True)
        jax.block_until_ready((hy, cy))
    except Exception:
        # Fallback for JAX/Mosaic builds that reject single-buffered
        # (pl.Buffered(1)) resident operands: keep default double buffering.
        hy, (_, cy) = fwd(x, hx, cx, w_ih_t, w_hh_t, b_fused,
                          single_buffer_weights=False)
        jax.block_until_ready((hy, cy))

    hy_ref, cy_ref = lstm_cell_ref(
        x, hx, cx, weight_ih, weight_hh, bias_ih, bias_hh)

    # bf16 MXU weights (and bf16 EUP on v6e/v7x) -> loosened tolerance vs the
    # pure-f32 reference.  Use compute_dtype=jnp.float32 in prepare_lstm_params
    # for tight f32 parity.
    assert jnp.allclose(hy, hy_ref, atol=7.5e-2, rtol=7.5e-2), "hy mismatch"
    assert jnp.allclose(cy, cy_ref, atol=7.5e-2, rtol=7.5e-2), "cy mismatch"

    print("KERNEL_OK")
</pallas_src>

<mosaic_0001>
module attributes {stable_mosaic.version = 11 : i64} {
  func.func @lstm_cell_kernel(%arg0: i32, %arg1: memref<8x128xf32, #tpu.memory_space<vmem>>, %arg2: memref<8x128xf32, #tpu.memory_space<vmem>>, %arg3: memref<8x128xf32, #tpu.memory_space<vmem>>, %arg4: memref<128x512xbf16, #tpu.memory_space<vmem>>, %arg5: memref<128x512xbf16, #tpu.memory_space<vmem>>, %arg6: memref<1x512xf32, #tpu.memory_space<vmem>>, %arg7: memref<8x128xf32, #tpu.memory_space<vmem>>, %arg8: memref<8x128xf32, #tpu.memory_space<vmem>>) attributes {dimension_semantics = [#tpu.dimension_semantics<parallel>], iteration_bounds = array<i64: 1>, scalar_prefetch = 0 : i64, scratch_operands = 0 : i64, tpu.core_type = #tpu.core_type<tc>, window_params = [{transform_indices = @transform_0, window_bounds = array<i64: 8, 128>}, {transform_indices = @transform_1, window_bounds = array<i64: 8, 128>}, {transform_indices = @transform_2, window_bounds = array<i64: 8, 128>}, {pipeline_mode = #tpu.pipeline_mode<synchronous>, transform_indices = @transform_3, window_bounds = array<i64: 128, 512>}, {pipeline_mode = #tpu.pipeline_mode<synchronous>, transform_indices = @transform_4, window_bounds = array<i64: 128, 512>}, {pipeline_mode = #tpu.pipeline_mode<synchronous>, transform_indices = @transform_5, window_bounds = array<i64: 1, 512>}, {transform_indices = @transform_6, window_bounds = array<i64: 8, 128>}, {transform_indices = @transform_7, window_bounds = array<i64: 8, 128>}]} {
    %c0 = arith.constant 0 : index
    %c0_0 = arith.constant 0 : index
    %0 = vector.load %arg1[%c0, %c0_0] : memref<8x128xf32, #tpu.memory_space<vmem>>, vector<8x128xf32>
    %1 = arith.truncf %0 : vector<8x128xf32> to vector<8x128xbf16>
    %c0_1 = arith.constant 0 : index
    %c0_2 = arith.constant 0 : index
    %2 = vector.load %arg4[%c0_1, %c0_2] : memref<128x512xbf16, #tpu.memory_space<vmem>>, vector<128x512xbf16>
    %cst = arith.constant dense<0.000000e+00> : vector<8x512xf32>
    %3 = tpu.matmul %1, %2, %cst {dimension_numbers = #tpu.dot_dimension_numbers<[1], [0], [0], [1], [0, 0, 1, 1], [], []>} : vector<8x128xbf16>, vector<128x512xbf16>, vector<8x512xf32> -> vector<8x512xf32>
    %c0_3 = arith.constant 0 : index
    %c0_4 = arith.constant 0 : index
    %4 = vector.load %arg2[%c0_3, %c0_4] : memref<8x128xf32, #tpu.memory_space<vmem>>, vector<8x128xf32>
    %5 = arith.truncf %4 : vector<8x128xf32> to vector<8x128xbf16>
    %c0_5 = arith.constant 0 : index
    %c0_6 = arith.constant 0 : index
    %6 = vector.load %arg5[%c0_5, %c0_6] : memref<128x512xbf16, #tpu.memory_space<vmem>>, vector<128x512xbf16>
    %cst_7 = arith.constant dense<0.000000e+00> : vector<8x512xf32>
    %7 = tpu.matmul %5, %6, %cst_7 {dimension_numbers = #tpu.dot_dimension_numbers<[1], [0], [0], [1], [0, 0, 1, 1], [], []>} : vector<8x128xbf16>, vector<128x512xbf16>, vector<8x512xf32> -> vector<8x512xf32>
    %8 = arith.addf %3, %7 : vector<8x512xf32>
    %c0_8 = arith.constant 0 : index
    %c0_9 = arith.constant 0 : index
    %9 = vector.load %arg6[%c0_8, %c0_9] : memref<1x512xf32, #tpu.memory_space<vmem>>, vector<1x512xf32>
    %10 = vector.broadcast %9 : vector<1x512xf32> to vector<8x512xf32>
    %11 = arith.addf %8, %10 : vector<8x512xf32>
    %12 = vector.extract_strided_slice %11 {offsets = [0, 0], sizes = [8, 128], strides = [1, 1]} : vector<8x512xf32> to vector<8x128xf32>
    %13 = arith.truncf %12 : vector<8x128xf32> to vector<8x128xbf16>
    %cst_10 = arith.constant 5.000000e-01 : bf16
    %14 = vector.broadcast %cst_10 : bf16 to vector<8x128xbf16>
    %15 = arith.mulf %14, %13 : vector<8x128xbf16>
    %16 = math.tanh %15 : vector<8x128xbf16>
    %cst_11 = arith.constant 5.000000e-01 : bf16
    %17 = vector.broadcast %cst_11 : bf16 to vector<8x128xbf16>
    %18 = arith.mulf %17, %16 : vector<8x128xbf16>
    %cst_12 = arith.constant 5.000000e-01 : bf16
    %19 = vector.broadcast %cst_12 : bf16 to vector<8x128xbf16>
    %20 = arith.addf %18, %19 : vector<8x128xbf16>
    %21 = arith.extf %20 : vector<8x128xbf16> to vector<8x128xf32>
    %22 = vector.extract_strided_slice %11 {offsets = [0, 128], sizes = [8, 128], strides = [1, 1]} : vector<8x512xf32> to vector<8x128xf32>
    %23 = arith.truncf %22 : vector<8x128xf32> to vector<8x128xbf16>
    %cst_13 = arith.constant 5.000000e-01 : bf16
    %24 = vector.broadcast %cst_13 : bf16 to vector<8x128xbf16>
    %25 = arith.mulf %24, %23 : vector<8x128xbf16>
    %26 = math.tanh %25 : vector<8x128xbf16>
    %cst_14 = arith.constant 5.000000e-01 : bf16
    %27 = vector.broadcast %cst_14 : bf16 to vector<8x128xbf16>
    %28 = arith.mulf %27, %26 : vector<8x128xbf16>
    %cst_15 = arith.constant 5.000000e-01 : bf16
    %29 = vector.broadcast %cst_15 : bf16 to vector<8x128xbf16>
    %30 = arith.addf %28, %29 : vector<8x128xbf16>
    %31 = arith.extf %30 : vector<8x128xbf16> to vector<8x128xf32>
    %32 = vector.extract_strided_slice %11 {offsets = [0, 256], sizes = [8, 128], strides = [1, 1]} : vector<8x512xf32> to vector<8x128xf32>
    %33 = arith.truncf %32 : vector<8x128xf32> to vector<8x128xbf16>
    %34 = math.tanh %33 : vector<8x128xbf16>
    %35 = arith.extf %34 : vector<8x128xbf16> to vector<8x128xf32>
    %36 = vector.extract_strided_slice %11 {offsets = [0, 384], sizes = [8, 128], strides = [1, 1]} : vector<8x512xf32> to vector<8x128xf32>
    %37 = arith.truncf %36 : vector<8x128xf32> to vector<8x128xbf16>
    %cst_16 = arith.constant 5.000000e-01 : bf16
    %38 = vector.broadcast %cst_16 : bf16 to vector<8x128xbf16>
    %39 = arith.mulf %38, %37 : vector<8x128xbf16>
    %40 = math.tanh %39 : vector<8x128xbf16>
    %cst_17 = arith.constant 5.000000e-01 : bf16
    %41 = vector.broadcast %cst_17 : bf16 to vector<8x128xbf16>
    %42 = arith.mulf %41, %40 : vector<8x128xbf16>
    %cst_18 = arith.constant 5.000000e-01 : bf16
    %43 = vector.broadcast %cst_18 : bf16 to vector<8x128xbf16>
    %44 = arith.addf %42, %43 : vector<8x128xbf16>
    %45 = arith.extf %44 : vector<8x128xbf16> to vector<8x128xf32>
    %c0_19 = arith.constant 0 : index
    %c0_20 = arith.constant 0 : index
    %46 = vector.load %arg3[%c0_19, %c0_20] : memref<8x128xf32, #tpu.memory_space<vmem>>, vector<8x128xf32>
    %47 = arith.mulf %31, %46 : vector<8x128xf32>
    %48 = arith.mulf %21, %35 : vector<8x128xf32>
    %49 = arith.addf %47, %48 : vector<8x128xf32>
    %50 = arith.truncf %49 : vector<8x128xf32> to vector<8x128xbf16>
    %51 = math.tanh %50 : vector<8x128xbf16>
    %52 = arith.extf %51 : vector<8x128xbf16> to vector<8x128xf32>
    %53 = arith.mulf %45, %52 : vector<8x128xf32>
    %c0_21 = arith.constant 0 : index
    %c0_22 = arith.constant 0 : index
    %54 = vector.load %arg7[%c0_21, %c0_22] : memref<8x128xf32, #tpu.memory_space<vmem>>, vector<8x128xf32>
    tpu.vector_store %arg7[%c0_21, %c0_22], %53 {strides = array<i32>} : memref<8x128xf32, #tpu.memory_space<vmem>>, vector<8x128xf32>,
    %c0_23 = arith.constant 0 : index
    %c0_24 = arith.constant 0 : index
    %55 = vector.load %arg8[%c0_23, %c0_24] : memref<8x128xf32, #tpu.memory_space<vmem>>, vector<8x128xf32>
    tpu.vector_store %arg8[%c0_23, %c0_24], %49 {strides = array<i32>} : memref<8x128xf32, #tpu.memory_space<vmem>>, vector<8x128xf32>,
    return
  }
  func.func @transform_0(%arg0: i32) -> (i32, i32) {
    %c0_i32 = arith.constant 0 : i32
    %c0_i32_0 = arith.constant 0 : i32
    return %arg0, %c0_i32 : i32, i32
  }
  func.func @transform_1(%arg0: i32) -> (i32, i32) {
    %c0_i32 = arith.constant 0 : i32
    %c0_i32_0 = arith.constant 0 : i32
    return %arg0, %c0_i32 : i32, i32
  }
  func.func @transform_2(%arg0: i32) -> (i32, i32) {
    %c0_i32 = arith.constant 0 : i32
    %c0_i32_0 = arith.constant 0 : i32
    return %arg0, %c0_i32 : i32, i32
  }
  func.func @transform_3(%arg0: i32) -> (i32, i32) {
    %c0_i32 = arith.constant 0 : i32
    %c0_i32_0 = arith.constant 0 : i32
    %c0_i32_1 = arith.constant 0 : i32
    return %c0_i32, %c0_i32_0 : i32, i32
  }
  func.func @transform_4(%arg0: i32) -> (i32, i32) {
    %c0_i32 = arith.constant 0 : i32
    %c0_i32_0 = arith.constant 0 : i32
    %c0_i32_1 = arith.constant 0 : i32
    return %c0_i32, %c0_i32_0 : i32, i32
  }
  func.func @transform_5(%arg0: i32) -> (i32, i32) {
    %c0_i32 = arith.constant 0 : i32
    %c0_i32_0 = arith.constant 0 : i32
    %c0_i32_1 = arith.constant 0 : i32
    return %c0_i32, %c0_i32_0 : i32, i32
  }
  func.func @transform_6(%arg0: i32) -> (i32, i32) {
    %c0_i32 = arith.constant 0 : i32
    %c0_i32_0 = arith.constant 0 : i32
    return %arg0, %c0_i32 : i32, i32
  }
  func.func @transform_7(%arg0: i32) -> (i32, i32) {
    %c0_i32 = arith.constant 0 : i32
    %c0_i32_0 = arith.constant 0 : i32
    return %arg0, %c0_i32 : i32, i32
  }
}

module attributes {stable_mosaic.version = 11 : i64} {
  func.func @lstm_cell_kernel(%arg0: i32, %arg1: memref<8x128xf32, #tpu.memory_space<vmem>>, %arg2: memref<8x128xf32, #tpu.memory_space<vmem>>, %arg3: memref<8x128xf32, #tpu.memory_space<vmem>>, %arg4: memref<128x512xbf16, #tpu.memory_space<vmem>>, %arg5: memref<128x512xbf16, #tpu.memory_space<vmem>>, %arg6: memref<1x512xf32, #tpu.memory_space<vmem>>, %arg7: memref<8x128xf32, #tpu.memory_space<vmem>>, %arg8: memref<8x128xf32, #tpu.memory_space<vmem>>) attributes {dimension_semantics = [#tpu.dimension_semantics<parallel>], iteration_bounds = array<i64: 1>, scalar_prefetch = 0 : i64, scratch_operands = 0 : i64, tpu.core_type = #tpu.core_type<tc>, window_params = [{transform_indices = @transform_0, window_bounds = array<i64: 8, 128>}, {transform_indices = @transform_1, window_bounds = array<i64: 8, 128>}, {transform_indices = @transform_2, window_bounds = array<i64: 8, 128>}, {pipeline_mode = #tpu.pipeline_mode<synchronous>, transform_indices = @transform_3, window_bounds = array<i64: 128, 512>}, {pipeline_mode = #tpu.pipeline_mode<synchronous>, transform_indices = @transform_4, window_bounds = array<i64: 128, 512>}, {pipeline_mode = #tpu.pipeline_mode<synchronous>, transform_indices = @transform_5, window_bounds = array<i64: 1, 512>}, {transform_indices = @transform_6, window_bounds = array<i64: 8, 128>}, {transform_indices = @transform_7, window_bounds = array<i64: 8, 128>}]} {
    %c0 = arith.constant 0 : index
    %c0_0 = arith.constant 0 : index
    %0 = vector.load %arg1[%c0, %c0_0] : memref<8x128xf32, #tpu.memory_space<vmem>>, vector<8x128xf32>
    %1 = arith.truncf %0 : vector<8x128xf32> to vector<8x128xbf16>
    %c0_1 = arith.constant 0 : index
    %c0_2 = arith.constant 0 : index
    %2 = vector.load %arg4[%c0_1, %c0_2] : memref<128x512xbf16, #tpu.memory_space<vmem>>, vector<128x512xbf16>
    %cst = arith.constant dense<0.000000e+00> : vector<8x512xf32>
    %3 = tpu.matmul %1, %2, %cst {dimension_numbers = #tpu.dot_dimension_numbers<[1], [0], [0], [1], [0, 0, 1, 1], [], []>} : vector<8x128xbf16>, vector<128x512xbf16>, vector<8x512xf32> -> vector<8x512xf32>
    %c0_3 = arith.constant 0 : index
    %c0_4 = arith.constant 0 : index
    %4 = vector.load %arg2[%c0_3, %c0_4] : memref<8x128xf32, #tpu.memory_space<vmem>>, vector<8x128xf32>
    %5 = arith.truncf %4 : vector<8x128xf32> to vector<8x128xbf16>
    %c0_5 = arith.constant 0 : index
    %c0_6 = arith.constant 0 : index
    %6 = vector.load %arg5[%c0_5, %c0_6] : memref<128x512xbf16, #tpu.memory_space<vmem>>, vector<128x512xbf16>
    %cst_7 = arith.constant dense<0.000000e+00> : vector<8x512xf32>
    %7 = tpu.matmul %5, %6, %cst_7 {dimension_numbers = #tpu.dot_dimension_numbers<[1], [0], [0], [1], [0, 0, 1, 1], [], []>} : vector<8x128xbf16>, vector<128x512xbf16>, vector<8x512xf32> -> vector<8x512xf32>
    %8 = arith.addf %3, %7 : vector<8x512xf32>
    %c0_8 = arith.constant 0 : index
    %c0_9 = arith.constant 0 : index
    %9 = vector.load %arg6[%c0_8, %c0_9] : memref<1x512xf32, #tpu.memory_space<vmem>>, vector<1x512xf32>
    %10 = vector.broadcast %9 : vector<1x512xf32> to vector<8x512xf32>
    %11 = arith.addf %8, %10 : vector<8x512xf32>
    %12 = vector.extract_strided_slice %11 {offsets = [0, 0], sizes = [8, 128], strides = [1, 1]} : vector<8x512xf32> to vector<8x128xf32>
    %13 = arith.truncf %12 : vector<8x128xf32> to vector<8x128xbf16>
    %cst_10 = arith.constant 5.000000e-01 : bf16
    %14 = vector.broadcast %cst_10 : bf16 to vector<8x128xbf16>
    %15 = arith.mulf %14, %13 : vector<8x128xbf16>
    %16 = math.tanh %15 : vector<8x128xbf16>
    %cst_11 = arith.constant 5.000000e-01 : bf16
    %17 = vector.broadcast %cst_11 : bf16 to vector<8x128xbf16>
    %18 = arith.mulf %17, %16 : vector<8x128xbf16>
    %cst_12 = arith.constant 5.000000e-01 : bf16
    %19 = vector.broadcast %cst_12 : bf16 to vector<8x128xbf16>
    %20 = arith.addf %18, %19 : vector<8x128xbf16>
    %21 = arith.extf %20 : vector<8x128xbf16> to vector<8x128xf32>
    %22 = vector.extract_strided_slice %11 {offsets = [0, 128], sizes = [8, 128], strides = [1, 1]} : vector<8x512xf32> to vector<8x128xf32>
    %23 = arith.truncf %22 : vector<8x128xf32> to vector<8x128xbf16>
    %cst_13 = arith.constant 5.000000e-01 : bf16
    %24 = vector.broadcast %cst_13 : bf16 to vector<8x128xbf16>
    %25 = arith.mulf %24, %23 : vector<8x128xbf16>
    %26 = math.tanh %25 : vector<8x128xbf16>
    %cst_14 = arith.constant 5.000000e-01 : bf16
    %27 = vector.broadcast %cst_14 : bf16 to vector<8x128xbf16>
    %28 = arith.mulf %27, %26 : vector<8x128xbf16>
    %cst_15 = arith.constant 5.000000e-01 : bf16
    %29 = vector.broadcast %cst_15 : bf16 to vector<8x128xbf16>
    %30 = arith.addf %28, %29 : vector<8x128xbf16>
    %31 = arith.extf %30 : vector<8x128xbf16> to vector<8x128xf32>
    %32 = vector.extract_strided_slice %11 {offsets = [0, 256], sizes = [8, 128], strides = [1, 1]} : vector<8x512xf32> to vector<8x128xf32>
    %33 = arith.truncf %32 : vector<8x128xf32> to vector<8x128xbf16>
    %34 = math.tanh %33 : vector<8x128xbf16>
    %35 = arith.extf %34 : vector<8x128xbf16> to vector<8x128xf32>
    %36 = vector.extract_strided_slice %11 {offsets = [0, 384], sizes = [8, 128], strides = [1, 1]} : vector<8x512xf32> to vector<8x128xf32>
    %37 = arith.truncf %36 : vector<8x128xf32> to vector<8x128xbf16>
    %cst_16 = arith.constant 5.000000e-01 : bf16
    %38 = vector.broadcast %cst_16 : bf16 to vector<8x128xbf16>
    %39 = arith.mulf %38, %37 : vector<8x128xbf16>
    %40 = math.tanh %39 : vector<8x128xbf16>
    %cst_17 = arith.constant 5.000000e-01 : bf16
    %41 = vector.broadcast %cst_17 : bf16 to vector<8x128xbf16>
    %42 = arith.mulf %41, %40 : vector<8x128xbf16>
    %cst_18 = arith.constant 5.000000e-01 : bf16
    %43 = vector.broadcast %cst_18 : bf16 to vector<8x128xbf16>
    %44 = arith.addf %42, %43 : vector<8x128xbf16>
    %45 = arith.extf %44 : vector<8x128xbf16> to vector<8x128xf32>
    %c0_19 = arith.constant 0 : index
    %c0_20 = arith.constant 0 : index
    %46 = vector.load %arg3[%c0_19, %c0_20] : memref<8x128xf32, #tpu.memory_space<vmem>>, vector<8x128xf32>
    %47 = arith.mulf %31, %46 : vector<8x128xf32>
    %48 = arith.mulf %21, %35 : vector<8x128xf32>
    %49 = arith.addf %47, %48 : vector<8x128xf32>
    %50 = arith.truncf %49 : vector<8x128xf32> to vector<8x128xbf16>
    %51 = math.tanh %50 : vector<8x128xbf16>
    %52 = arith.extf %51 : vector<8x128xbf16> to vector<8x128xf32>
    %53 = arith.mulf %45, %52 : vector<8x128xf32>
    %c0_21 = arith.constant 0 : index
    %c0_22 = arith.constant 0 : index
    %54 = vector.load %arg7[%c0_21, %c0_22] : memref<8x128xf32, #tpu.memory_space<vmem>>, vector<8x128xf32>
    tpu.vector_store %arg7[%c0_21, %c0_22], %53 {strides = array<i32>} : memref<8x128xf32, #tpu.memory_space<vmem>>, vector<8x128xf32>,
    %c0_23 = arith.constant 0 : index
    %c0_24 = arith.constant 0 : index
    %55 = vector.load %arg8[%c0_23, %c0_24] : memref<8x128xf32, #tpu.memory_space<vmem>>, vector<8x128xf32>
    tpu.vector_store %arg8[%c0_23, %c0_24], %49 {strides = array<i32>} : memref<8x128xf32, #tpu.memory_space<vmem>>, vector<8x128xf32>,
    return
  }
  func.func @transform_0(%arg0: i32) -> (i32, i32) {
    %c0_i32 = arith.constant 0 : i32
    %c0_i32_0 = arith.constant 0 : i32
    return %arg0, %c0_i32 : i32, i32
  }
  func.func @transform_1(%arg0: i32) -> (i32, i32) {
    %c0_i32 = arith.constant 0 : i32
    %c0_i32_0 = arith.constant 0 : i32
    return %arg0, %c0_i32 : i32, i32
  }
  func.func @transform_2(%arg0: i32) -> (i32, i32) {
    %c0_i32 = arith.constant 0 : i32
    %c0_i32_0 = arith.constant 0 : i32
    return %arg0, %c0_i32 : i32, i32
  }
  func.func @transform_3(%arg0: i32) -> (i32, i32) {
    %c0_i32 = arith.constant 0 : i32
    %c0_i32_0 = arith.constant 0 : i32
    %c0_i32_1 = arith.constant 0 : i32
    return %c0_i32, %c0_i32_0 : i32, i32
  }
  func.func @transform_4(%arg0: i32) -> (i32, i32) {
    %c0_i32 = arith.constant 0 : i32
    %c0_i32_0 = arith.constant 0 : i32
    %c0_i32_1 = arith.constant 0 : i32
    return %c0_i32, %c0_i32_0 : i32, i32
  }
  func.func @transform_5(%arg0: i32) -> (i32, i32) {
    %c0_i32 = arith.constant 0 : i32
    %c0_i32_0 = arith.constant 0 : i32
    %c0_i32_1 = arith.constant 0 : i32
    return %c0_i32, %c0_i32_0 : i32, i32
  }
  func.func @transform_6(%arg0: i32) -> (i32, i32) {
    %c0_i32 = arith.constant 0 : i32
    %c0_i32_0 = arith.constant 0 : i32
    return %arg0, %c0_i32 : i32, i32
  }
  func.func @transform_7(%arg0: i32) -> (i32, i32) {
    %c0_i32 = arith.constant 0 : i32
    %c0_i32_0 = arith.constant 0 : i32
    return %arg0, %c0_i32 : i32, i32
  }
}

</mosaic_0001>

<bundles_post_ra>
// kernel: lstm_cell_forward.1
= control target key start
LH: loop header
LB: loop body
LE: loop exit
PB: predicated region body
PF: predicated region fallthrough
CT: control target
= control target key end

     0   :  { %13 = vsyncpa [#allocation3], 0  ;;  %s1001_s0 = inlined_call_operand.vmem [shape: f32[8,128], index: 0, kind: input, shape index: {}]   ;;  %s1002_s1 = inlined_call_operand.vmem [shape: f32[8,128], index: 1, kind: input, shape index: {}]   ;;  %s1003_s2 = inlined_call_operand.vmem [shape: f32[8,128], index: 2, kind: input, shape index: {}]   ;;  %s1004_s3 = inlined_call_operand.hbm [shape: bf16[128,512], index: 3, kind: input, shape index: {}]   ;;  %s1005_s4 = inlined_call_operand.hbm [shape: bf16[128,512], index: 4, kind: input, shape index: {}]   ;;  %s1006_s5 = inlined_call_operand.vmem [shape: f32[1,512], index: 5, kind: input, shape index: {}]   ;;  %s1007_s6 = inlined_call_operand.vmem [shape: f32[8,128], index: 6, kind: output, shape index: {0}]   ;;  %s1008_s7 = inlined_call_operand.hbm [shape: f32[8,128], index: 7, kind: output, shape index: {1}]  }
   0x1   :  { %14 = vsyncpa [#allocation6], 0 }
   0x2   :  { %15 = vsyncpa [#allocation4], 0  ;;  %s927_s24 = smov [#allocation2]  }
   0x3   :  { %s27_s25 = sshll.u32 %s927_s24, 4  ;;  %s28_s25 = int_to_ptr.vmem [resolvable:$true] %s27_s25 }
   0x4   :  { %s869_s26 = scalar_lea.vmem %s28_s25, 4096  ;;  %p874_p1 = scmp.lt.s32.totalorder %s28_s25, %s28_s25 }
   0x5   :  { %p870_p0 = scmp.ne.s32.totalorder %s28_s25, %s869_s26  ;;  %p875_p2 = scmp.lt.s32.totalorder %s869_s26, %s869_s26 }
   0x7   :  { %p876_p3 = por %p875_p2, %p874_p1 }
   0x9   :  { %p877_p4 = pnand %p876_p3, %p870_p0 }
   0xb   :  { %880 = shalt.err (!%p877_p4)
}
   0xc   :  { %s928_s27 = smov 256   ;;  %s929_s28 = smov 16  }
   0xd   :  { %33 = dma.hbm_to_vmem [thread:$0]  %s1004_s3, 4096, %s28_s25, [#allocation3], %s928_s27, %s928_s27, %s929_s28  }
   0xe   :  { %s930_s8 = smov [#allocation5]  }
   0xf   :  { %s39_s9 = sshll.u32 %s930_s8, 4  ;;  %s40_s9 = int_to_ptr.vmem [resolvable:$true] %s39_s9 }
  0x10   :  { %s889_s10 = scalar_lea.vmem %s40_s9, 4096  ;;  %p894_p6 = scmp.lt.s32.totalorder %s40_s9, %s40_s9 }
  0x11   :  { %p890_p5 = scmp.ne.s32.totalorder %s40_s9, %s889_s10  ;;  %p895_p7 = scmp.lt.s32.totalorder %s889_s10, %s889_s10 }
  0x13   :  { %p896_p8 = por %p895_p7, %p894_p6 }
  0x15   :  { %p897_p9 = pnand %p896_p8, %p890_p5 }
  0x17   :  { %900 = shalt.err (!%p897_p9)
}
  0x18   :  { %45 = dma.hbm_to_vmem [thread:$0]  %s1005_s4, 4096, %s40_s9, [#allocation6], %s928_s27, %s928_s27, %s929_s28  }
  0x19   :  { %921 = dma.done.wait [#allocation3], 4096  }
  0x1a   :  { %922 = vsyncadd [#allocation3], 4294963200 }
  0x1b   :  { %923 = dma.done.wait [#allocation6], 4096  }
  0x1c   :  { %924 = vsyncadd [#allocation6], 4294963200  ;;  %v931_v0 = vmov 0   ;;  %v755_v1 = vld [vmem:[#allocation5 + $0xe4] ss:$16 sps:$4 sm:$0xff]   ;;  %s932_s16 = smov [#allocation7]  }
  0x1d   :  { %316 = vmatprep.mubr.bf16.mxu0 %v931_v0  ;;  %357 = vmatprep.mubr.bf16.mxu1 %v931_v0  ;;  %v757_v2 = vld [vmem:[#allocation5 + $0xec] ss:$16 sps:$4 sm:$0xff]   ;;  %v759_v3 = vld [vmem:[#allocation5 + $0xe0] ss:$16 sps:$4 sm:$0xff]   ;;  %v760_v4 = vld [vmem:[#allocation5 + $0xe8] ss:$16 sps:$4 sm:$0xff]  }
  0x1e   :  { %284 = vmatprep.subr.bf16.mxu0 %v755_v1  ;;  %325 = vmatprep.subr.bf16.mxu1 %v757_v2  ;;  %v761_v5 = vld [vmem:[#allocation5 + $0xc4] ss:$16 sps:$4 sm:$0xff]   ;;  %v763_v6 = vld [vmem:[#allocation5 + $0xcc] ss:$16 sps:$4 sm:$0xff]   ;;  %v765_v7 = vld [vmem:[#allocation5 + $0xc0] ss:$16 sps:$4 sm:$0xff]  }
  0x1f   :  { %285 = vmatpush1.bf16.msra.mxu0 %v759_v3  ;;  %326 = vmatpush1.bf16.msra.mxu1 %v760_v4  ;;  %v766_v8 = vld [vmem:[#allocation5 + $0xc8] ss:$16 sps:$4 sm:$0xff]   ;;  %v767_v9 = vld [vmem:[#allocation5 + $0xa4] ss:$16 sps:$4 sm:$0xff]   ;;  %v769_v10 = vld [vmem:[#allocation5 + $0xac] ss:$16 sps:$4 sm:$0xff]  }
  0x20   :  { %286 = vmatprep.subr.bf16.mxu0 %v761_v5  ;;  %327 = vmatprep.subr.bf16.mxu1 %v763_v6  ;;  %v771_v11 = vld [vmem:[#allocation5 + $0xa0] ss:$16 sps:$4 sm:$0xff]   ;;  %v772_v12 = vld [vmem:[#allocation5 + $0xa8] ss:$16 sps:$4 sm:$0xff]   ;;  %v773_v13 = vld [vmem:[#allocation5 + $0x84] ss:$16 sps:$4 sm:$0xff]  }
  0x21   :  { %v775_v14 = vld [vmem:[#allocation5 + $0x8c] ss:$16 sps:$4 sm:$0xff]   ;;  %v777_v15 = vld [vmem:[#allocation5 + $0x80] ss:$16 sps:$4 sm:$0xff]   ;;  %v778_v16 = vld [vmem:[#allocation5 + $0x88] ss:$16 sps:$4 sm:$0xff]  }
  0x22   :  { %v779_v17 = vld [vmem:[#allocation5 + $0x64] ss:$16 sps:$4 sm:$0xff]   ;;  %v781_v18 = vld [vmem:[#allocation5 + $0x6c] ss:$16 sps:$4 sm:$0xff]   ;;  %v783_v19 = vld [vmem:[#allocation5 + $0x60] ss:$16 sps:$4 sm:$0xff]  }
  0x23   :  { %287 = vmatpush1.bf16.msra.mxu0 %v765_v7  ;;  %328 = vmatpush1.bf16.msra.mxu1 %v766_v8  ;;  %v784_v20 = vld [vmem:[#allocation5 + $0x68] ss:$16 sps:$4 sm:$0xff]   ;;  %v785_v21 = vld [vmem:[#allocation5 + $0x44] ss:$16 sps:$4 sm:$0xff]   ;;  %v787_v22 = vld [vmem:[#allocation5 + $0x4c] ss:$16 sps:$4 sm:$0xff]  }
  0x24   :  { %288 = vmatprep.subr.bf16.mxu0 %v767_v9  ;;  %329 = vmatprep.subr.bf16.mxu1 %v769_v10  ;;  %v789_v23 = vld [vmem:[#allocation5 + $0x40] ss:$16 sps:$4 sm:$0xff]   ;;  %v790_v24 = vld [vmem:[#allocation5 + $0x48] ss:$16 sps:$4 sm:$0xff]   ;;  %v791_v25 = vld [vmem:[#allocation5 + $0x24] ss:$16 sps:$4 sm:$0xff]  }
  0x25   :  { %v793_v26 = vld [vmem:[#allocation5 + $0x2c] ss:$16 sps:$4 sm:$0xff]   ;;  %v795_v27 = vld [vmem:[#allocation5 + $0x20] ss:$16 sps:$4 sm:$0xff]   ;;  %v796_v28 = vld [vmem:[#allocation5 + $0x28] ss:$16 sps:$4 sm:$0xff]  }
  0x26   :  { %v797_v29 = vld [vmem:[#allocation5 + $0x4] ss:$16 sps:$4 sm:$0xff]   ;;  %v799_v30 = vld [vmem:[#allocation5 + $0xc] ss:$16 sps:$4 sm:$0xff]   ;;  %v801_v31 = vld [vmem:[#allocation5] ss:$16 sps:$4 sm:$0xff]  }
  0x27   :  { %289 = vmatpush1.bf16.msra.mxu0 %v771_v11  ;;  %330 = vmatpush1.bf16.msra.mxu1 %v772_v12  ;;  %v802_v32 = vld [vmem:[#allocation5 + $0x8] ss:$16 sps:$4 sm:$0xff]   ;;  %v90_v33 = vld [vmem:[%s1002_s1] sm:$0xff]  ;;  %v808_v35 = vld [vmem:[#allocation2 + $0xec] ss:$16 sps:$4 sm:$0xff]   ;;  %s673_s17 = sshll.u32 %s932_s16, 4  ;;  %s674_s17 = int_to_ptr.vmem [resolvable:$true] %s673_s17 }
  0x28   :  { %290 = vmatprep.subr.bf16.mxu0 %v773_v13  ;;  %331 = vmatprep.subr.bf16.mxu1 %v775_v14  ;;  %v805_v34 = vld [vmem:[#allocation2 + $0xe4] ss:$16 sps:$4 sm:$0xff]   ;;  %v91_v36 = vpack.c.bf16 %v90_v33, %v90_v33  ;;  %v803_v37 = vld [vmem:[#allocation2 + $0xe0] ss:$16 sps:$4 sm:$0xff]   ;;  %v806_v38 = vld [vmem:[#allocation2 + $0xe8] ss:$16 sps:$4 sm:$0xff]   ;;  %v610_v13 = vlaneseq  ;;  %p906_p11 = scmp.lt.s32.totalorder %s674_s17, %s674_s17 }
  0x29   :  { %v811_v39 = vld [vmem:[#allocation2 + $0xc4] ss:$16 sps:$4 sm:$0xff]   ;;  %v814_v40 = vld [vmem:[#allocation2 + $0xcc] ss:$16 sps:$4 sm:$0xff]   ;;  %v809_v41 = vld [vmem:[#allocation2 + $0xc0] ss:$16 sps:$4 sm:$0xff]  }
  0x2a   :  { %v812_v42 = vld [vmem:[#allocation2 + $0xc8] ss:$16 sps:$4 sm:$0xff]   ;;  %v817_v43 = vld [vmem:[#allocation2 + $0xa4] ss:$16 sps:$4 sm:$0xff]   ;;  %v820_v44 = vld [vmem:[#allocation2 + $0xac] ss:$16 sps:$4 sm:$0xff]  }
  0x2b   :  { %291 = vmatpush1.bf16.msra.mxu0 %v777_v15  ;;  %332 = vmatpush1.bf16.msra.mxu1 %v778_v16  ;;  %v815_v45 = vld [vmem:[#allocation2 + $0xa0] ss:$16 sps:$4 sm:$0xff]   ;;  %v818_v46 = vld [vmem:[#allocation2 + $0xa8] ss:$16 sps:$4 sm:$0xff]   ;;  %v823_v47 = vld [vmem:[#allocation2 + $0x84] ss:$16 sps:$4 sm:$0xff]  }
  0x2c   :  { %292 = vmatprep.subr.bf16.mxu0 %v779_v17  ;;  %333 = vmatprep.subr.bf16.mxu1 %v781_v18  ;;  %v826_v48 = vld [vmem:[#allocation2 + $0x8c] ss:$16 sps:$4 sm:$0xff]   ;;  %v821_v49 = vld [vmem:[#allocation2 + $0x80] ss:$16 sps:$4 sm:$0xff]   ;;  %v824_v50 = vld [vmem:[#allocation2 + $0x88] ss:$16 sps:$4 sm:$0xff]  }
  0x2d   :  { %v829_v51 = vld [vmem:[#allocation2 + $0x64] ss:$16 sps:$4 sm:$0xff]   ;;  %v832_v52 = vld [vmem:[#allocation2 + $0x6c] ss:$16 sps:$4 sm:$0xff]   ;;  %v827_v53 = vld [vmem:[#allocation2 + $0x60] ss:$16 sps:$4 sm:$0xff]  }
  0x2e   :  { %v830_v54 = vld [vmem:[#allocation2 + $0x68] ss:$16 sps:$4 sm:$0xff]   ;;  %v835_v55 = vld [vmem:[#allocation2 + $0x44] ss:$16 sps:$4 sm:$0xff]   ;;  %v838_v56 = vld [vmem:[#allocation2 + $0x4c] ss:$16 sps:$4 sm:$0xff]  }
  0x2f   :  { %293 = vmatpush1.bf16.msra.mxu0 %v783_v19  ;;  %334 = vmatpush1.bf16.msra.mxu1 %v784_v20  ;;  %v833_v57 = vld [vmem:[#allocation2 + $0x40] ss:$16 sps:$4 sm:$0xff]   ;;  %v836_v58 = vld [vmem:[#allocation2 + $0x48] ss:$16 sps:$4 sm:$0xff]   ;;  %v841_v59 = vld [vmem:[#allocation2 + $0x24] ss:$16 sps:$4 sm:$0xff]  }
  0x30   :  { %294 = vmatprep.subr.bf16.mxu0 %v785_v21  ;;  %335 = vmatprep.subr.bf16.mxu1 %v787_v22  ;;  %v844_v60 = vld [vmem:[#allocation2 + $0x2c] ss:$16 sps:$4 sm:$0xff]   ;;  %v839_v61 = vld [vmem:[#allocation2 + $0x20] ss:$16 sps:$4 sm:$0xff]   ;;  %v842_v62 = vld [vmem:[#allocation2 + $0x28] ss:$16 sps:$4 sm:$0xff]  }
  0x31   :  { %v847_v63 = vld [vmem:[#allocation2 + $0x4] ss:$16 sps:$4 sm:$0xff]   ;;  %v845_v1 = vld [vmem:[#allocation2] ss:$16 sps:$4 sm:$0xff]   ;;  %v848_v2 = vld [vmem:[#allocation2 + $0x8] ss:$16 sps:$4 sm:$0xff]  }
  0x32   :  { %v56_v3 = vld [vmem:[%s1001_s0] sm:$0xff]  ;;  %v611_v14 = vshrl.u32 %v610_v13, 7  ;;  %s901_s18 = scalar_lea.vmem %s674_s17, 128 }
  0x33   :  { %295 = vmatpush1.bf16.msra.mxu0 %v789_v23  ;;  %336 = vmatpush1.bf16.msra.mxu1 %v790_v24  ;;  %v57_v4 = vpack.c.bf16 %v56_v3, %v56_v3  ;;  %v608_v16 = vld [vmem:[%s1006_s5] sm:$0xf]  ;;  %p902_p10 = scmp.ne.s32.totalorder %s674_s17, %s901_s18  ;;  %p907_p12 = scmp.lt.s32.totalorder %s901_s18, %s901_s18 }
  0x34   :  { %296 = vmatprep.subr.bf16.mxu0 %v791_v25  ;;  %337 = vmatprep.subr.bf16.mxu1 %v793_v26  ;;  %v612_v15 = vsub.s32 0, %v611_v14  ;;  %v620_v17 = vsub.s32 2, %v611_v14  ;;  %v616_v18 = vsub.s32 1, %v611_v14 }
  0x35   :  { %p908_p13 = por %p907_p12, %p906_p11 }
  0x36   :  { %v613_v19 = vrot.slane %v608_v16, %v612_v15  ;;  %v621_v24 = vrot.slane %v608_v16, %v620_v17  ;;  %v617_v25 = vrot.slane %v608_v16, %v616_v18 }
  0x37   :  { %297 = vmatpush1.bf16.msra.mxu0 %v795_v27  ;;  %338 = vmatpush1.bf16.msra.mxu1 %v796_v28  ;;  %p909_p0 = pnand %p908_p13, %p902_p10 }
  0x38   :  { %298 = vmatprep.subr.bf16.mxu0 %v797_v29  ;;  %339 = vmatprep.subr.bf16.mxu1 %v799_v30 }
  0x3b   :  { %299 = vmatpush1.bf16.msra.mxu0 %v801_v31  ;;  %340 = vmatpush1.bf16.msra.mxu1 %v802_v32 }
  0x3c   :  { %526 = vmatprep.subr.bf16.mxu0 %v805_v34  ;;  %567 = vmatprep.subr.bf16.mxu1 %v808_v35 }
  0x3e   :  { %317 = vmatmul.mubr.bf16.vlgmr.msra.gmra.mxu0 %v91_v36  ;;  %358 = vmatmul.mubr.bf16.vlgmr.msra.gmra.mxu1 %v91_v36 }
  0x3f   :  { %527 = vmatpush1.bf16.msra.mxu0 %v803_v37  ;;  %568 = vmatpush1.bf16.msra.mxu1 %v806_v38 }
  0x40   :  { %528 = vmatprep.subr.bf16.mxu0 %v811_v39  ;;  %569 = vmatprep.subr.bf16.mxu1 %v814_v40  ;;  %v624_v39 = vsub.s32 3, %v611_v14 }
  0x41   :  { %558 = vmatprep.mubr.bf16.mxu0 %v931_v0  ;;  %599 = vmatprep.mubr.bf16.mxu1 %v931_v0  ;;  %v850_v0 = vld [vmem:[#allocation2 + $0xc] ss:$16 sps:$4 sm:$0xff]  }
  0x43   :  { %529 = vmatpush1.bf16.msra.mxu0 %v809_v41  ;;  %570 = vmatpush1.bf16.msra.mxu1 %v812_v42 }
  0x44   :  { %530 = vmatprep.subr.bf16.mxu0 %v817_v43  ;;  %571 = vmatprep.subr.bf16.mxu1 %v820_v44  ;;  %v625_v43 = vrot.slane %v608_v16, %v624_v39 }
  0x47   :  { %531 = vmatpush1.bf16.msra.mxu0 %v815_v45  ;;  %572 = vmatpush1.bf16.msra.mxu1 %v818_v46 }
  0x48   :  { %532 = vmatprep.subr.bf16.mxu0 %v823_v47  ;;  %573 = vmatprep.subr.bf16.mxu1 %v826_v48 }
  0x4b   :  { %533 = vmatpush1.bf16.msra.mxu0 %v821_v49  ;;  %574 = vmatpush1.bf16.msra.mxu1 %v824_v50 }
  0x4c   :  { %534 = vmatprep.subr.bf16.mxu0 %v829_v51  ;;  %575 = vmatprep.subr.bf16.mxu1 %v832_v52 }
  0x4f   :  { %535 = vmatpush1.bf16.msra.mxu0 %v827_v53  ;;  %576 = vmatpush1.bf16.msra.mxu1 %v830_v54 }
  0x50   :  { %536 = vmatprep.subr.bf16.mxu0 %v835_v55  ;;  %577 = vmatprep.subr.bf16.mxu1 %v838_v56  ;;  %v655_v55 = vld [vmem:[%s1003_s2] sm:$0xff] }
  0x53   :  { %537 = vmatpush1.bf16.msra.mxu0 %v833_v57  ;;  %578 = vmatpush1.bf16.msra.mxu1 %v836_v58 }
  0x54   :  { %538 = vmatprep.subr.bf16.mxu0 %v841_v59  ;;  %579 = vmatprep.subr.bf16.mxu1 %v844_v60 }
  0x57   :  { %539 = vmatpush1.bf16.msra.mxu0 %v839_v61  ;;  %580 = vmatpush1.bf16.msra.mxu1 %v842_v62 }
  0x58   :  { %540 = vmatprep.subr.bf16.mxu0 %v847_v63  ;;  %581 = vmatprep.subr.bf16.mxu1 %v850_v0 }
  0x5b   :  { %541 = vmatpush1.bf16.msra.mxu0 %v845_v1  ;;  %582 = vmatpush1.bf16.msra.mxu1 %v848_v2 }
  0x5e   :  { %559 = vmatmul.mubr.bf16.vlgmr.msra.gmra.mxu0 %v57_v4  ;;  %600 = vmatmul.mubr.bf16.vlgmr.msra.gmra.mxu1 %v57_v4 }
  0xfe   :  { %v318_v5 = vpop.f32.mrf.mxu0  ;;  %v359_v6 = vpop.f32.mrf.mxu1 }
 0x100   :  { %v320_v7 = vpop.f32.mrf.mxu0  ;;  %v361_v8 = vpop.f32.mrf.mxu1 }
 0x102   :  { %v322_v9 = vpop.f32.mrf.mxu0  ;;  %v363_v10 = vpop.f32.mrf.mxu1 }
 0x104   :  { %v323_v11 = vpop.f32.mrf.mxu0  ;;  %v364_v12 = vpop.f32.mrf.mxu1 }
 0x11e   :  { %v560_v20 = vpop.f32.mrf.mxu0  ;;  %v601_v21 = vpop.f32.mrf.mxu1 }
 0x11f   :  { %v561_v22 = vadd.f32 %v560_v20, %v318_v5  ;;  %v602_v23 = vadd.f32 %v601_v21, %v359_v6 }
 0x120   :  { %v562_v26 = vpop.f32.mrf.mxu0  ;;  %v603_v27 = vpop.f32.mrf.mxu1 }
 0x121   :  { %v630_v28 = vadd.f32 %v613_v19, %v561_v22  ;;  %v563_v29 = vadd.f32 %v562_v26, %v320_v7  ;;  %v632_v33 = vadd.f32 %v621_v24, %v602_v23  ;;  %v604_v42 = vadd.f32 %v603_v27, %v361_v8 }
 0x122   :  { %v564_v30 = vpop.f32.mrf.mxu0  ;;  %v605_v31 = vpop.f32.mrf.mxu1 }
 0x123   :  { %v634_v32 = vpack.c.bf16 %v630_v28, %v630_v28  ;;  %v631_v34 = vadd.f32 %v617_v25, %v563_v29  ;;  %v646_v40 = vpack.c.bf16 %v632_v33, %v632_v33  ;;  %v633_v44 = vadd.f32 %v625_v43, %v604_v42 }
 0x124   :  { %v565_v35 = vpop.f32.mrf.mxu0  ;;  %v606_v36 = vpop.f32.mrf.mxu1 }
 0x125   :  { %v635_v37 = vmul.bf16 1056980736, %v634_v32  ;;  %v640_v38 = vpack.c.bf16 %v631_v34, %v631_v34  ;;  %v649_v45 = vpack.c.bf16 %v633_v44, %v633_v44 }
 0x127   :  { %851 = vtanh.bf16 %v635_v37  ;;  %v641_v41 = vmul.bf16 1056980736, %v640_v38  ;;  %v650_v48 = vmul.bf16 1056980736, %v649_v45 }
 0x129   :  { %853 = vtanh.bf16 %v641_v41 }
 0x12a   :  { %855 = vtanh.bf16 %v646_v40 }
 0x12b   :  { %857 = vtanh.bf16 %v650_v48 }
 0x135   :  { %v852_v46 = vpop.eup %851 }
 0x136   :  { %v637_v47 = vmul.bf16 1056980736, %v852_v46 }
 0x137   :  { %v854_v49 = vpop.eup %853 }
 0x138   :  { %v643_v50 = vmul.bf16 1056980736, %v854_v49  ;;  %v638_v51 = vadd.bf16 1056980736, %v637_v47  ;;  %v856_v52 = vpop.eup %855 }
 0x139   :  { %v648_v56 = vunpack.c.l.bf16 %v856_v52 }
 0x13a   :  { %v639_v53 = vunpack.c.l.bf16 %v638_v51  ;;  %v644_v54 = vadd.bf16 1056980736, %v643_v50 }
 0x13c   :  { %v645_v57 = vunpack.c.l.bf16 %v644_v54  ;;  %v657_v59 = vmul.f32 %v648_v56, %v639_v53 }
 0x13e   :  { %v656_v58 = vmul.f32 %v655_v55, %v645_v57 }
 0x140   :  { %v658_v60 = vadd.f32 %v657_v59, %v656_v58 }
 0x142   :  { %v659_v61 = vpack.c.bf16 %v658_v60, %v658_v60  ;;  %664 = vst [vmem:[#allocation7] sm:$0xff] %v658_v60 }
 0x143   :  { %912 = shalt.err (!%p909_p0)
}
 0x144   :  { %676 = dma.vmem_to_hbm [thread:$0]  %s674_s17, 128, %s1008_s7, [#allocation4]   ;;  %859 = vtanh.bf16 %v659_v61  ;;  %v858_v62 = vpop.eup %857 }
 0x145   :  { %v652_v63 = vmul.bf16 1056980736, %v858_v62 }
 0x147   :  { %v653_v0 = vadd.bf16 1056980736, %v652_v63 }
 0x149   :  { %v654_v2 = vunpack.c.l.bf16 %v653_v0 }
 0x152   :  { %v860_v1 = vpop.eup %859 }
 0x153   :  { %v661_v3 = vunpack.c.l.bf16 %v860_v1 }
 0x155   :  { %v662_v4 = vmul.f32 %v661_v3, %v654_v2 }
 0x157   :  { %663 = vst [vmem:[%s1007_s6] sm:$0xff] %v662_v4 }
 0x158   :  { %925 = dma.done.wait [#allocation4], 128  }
 0x159   :  { %926 = vsyncadd [#allocation4], 4294967168 }
 0x15a   :  { %682 = vsyncpa [#allocation3], 1 }
 0x15b   :  { %683 = vsyncpa [#allocation6], 1 }
 0x15c   :  { %684 = vsyncpa [#allocation4], 1 }

// kernel: lstm_cell_forward.1
= control target key start
LH: loop header
LB: loop body
LE: loop exit
PB: predicated region body
PF: predicated region fallthrough
CT: control target
= control target key end

     0   :  { %13 = vsyncpa [#allocation3], 0  ;;  %s1001_s0 = inlined_call_operand.vmem [shape: f32[8,128], index: 0, kind: input, shape index: {}]   ;;  %s1002_s1 = inlined_call_operand.vmem [shape: f32[8,128], index: 1, kind: input, shape index: {}]   ;;  %s1003_s2 = inlined_call_operand.vmem [shape: f32[8,128], index: 2, kind: input, shape index: {}]   ;;  %s1004_s3 = inlined_call_operand.hbm [shape: bf16[128,512], index: 3, kind: input, shape index: {}]   ;;  %s1005_s4 = inlined_call_operand.hbm [shape: bf16[128,512], index: 4, kind: input, shape index: {}]   ;;  %s1006_s5 = inlined_call_operand.vmem [shape: f32[1,512], index: 5, kind: input, shape index: {}]   ;;  %s1007_s6 = inlined_call_operand.vmem [shape: f32[8,128], index: 6, kind: output, shape index: {0}]   ;;  %s1008_s7 = inlined_call_operand.hbm [shape: f32[8,128], index: 7, kind: output, shape index: {1}]  }
   0x1   :  { %14 = vsyncpa [#allocation6], 0 }
   0x2   :  { %15 = vsyncpa [#allocation4], 0  ;;  %s927_s24 = smov [#allocation2]  }
   0x3   :  { %s27_s25 = sshll.u32 %s927_s24, 4  ;;  %s28_s25 = int_to_ptr.vmem [resolvable:$true] %s27_s25 }
   0x4   :  { %s869_s26 = scalar_lea.vmem %s28_s25, 4096  ;;  %p874_p1 = scmp.lt.s32.totalorder %s28_s25, %s28_s25 }
   0x5   :  { %p870_p0 = scmp.ne.s32.totalorder %s28_s25, %s869_s26  ;;  %p875_p2 = scmp.lt.s32.totalorder %s869_s26, %s869_s26 }
   0x7   :  { %p876_p3 = por %p875_p2, %p874_p1 }
   0x9   :  { %p877_p4 = pnand %p876_p3, %p870_p0 }
   0xb   :  { %880 = shalt.err (!%p877_p4)
}
   0xc   :  { %s928_s27 = smov 256   ;;  %s929_s28 = smov 16  }
   0xd   :  { %33 = dma.hbm_to_vmem [thread:$0]  %s1004_s3, 4096, %s28_s25, [#allocation3], %s928_s27, %s928_s27, %s929_s28  }
   0xe   :  { %s930_s8 = smov [#allocation5]  }
   0xf   :  { %s39_s9 = sshll.u32 %s930_s8, 4  ;;  %s40_s9 = int_to_ptr.vmem [resolvable:$true] %s39_s9 }
  0x10   :  { %s889_s10 = scalar_lea.vmem %s40_s9, 4096  ;;  %p894_p6 = scmp.lt.s32.totalorder %s40_s9, %s40_s9 }
  0x11   :  { %p890_p5 = scmp.ne.s32.totalorder %s40_s9, %s889_s10  ;;  %p895_p7 = scmp.lt.s32.totalorder %s889_s10, %s889_s10 }
  0x13   :  { %p896_p8 = por %p895_p7, %p894_p6 }
  0x15   :  { %p897_p9 = pnand %p896_p8, %p890_p5 }
  0x17   :  { %900 = shalt.err (!%p897_p9)
}
  0x18   :  { %45 = dma.hbm_to_vmem [thread:$0]  %s1005_s4, 4096, %s40_s9, [#allocation6], %s928_s27, %s928_s27, %s929_s28  }
  0x19   :  { %921 = dma.done.wait [#allocation3], 4096  }
  0x1a   :  { %922 = vsyncadd [#allocation3], 4294963200 }
  0x1b   :  { %923 = dma.done.wait [#allocation6], 4096  }
  0x1c   :  { %924 = vsyncadd [#allocation6], 4294963200  ;;  %v931_v0 = vmov 0   ;;  %v755_v1 = vld [vmem:[#allocation5 + $0xe4] ss:$16 sps:$4 sm:$0xff]   ;;  %s932_s16 = smov [#allocation7]  }
  0x1d   :  { %316 = vmatprep.mubr.bf16.mxu0 %v931_v0  ;;  %357 = vmatprep.mubr.bf16.mxu1 %v931_v0  ;;  %v757_v2 = vld [vmem:[#allocation5 + $0xec] ss:$16 sps:$4 sm:$0xff]   ;;  %v759_v3 = vld [vmem:[#allocation5 + $0xe0] ss:$16 sps:$4 sm:$0xff]   ;;  %v760_v4 = vld [vmem:[#allocation5 + $0xe8] ss:$16 sps:$4 sm:$0xff]  }
  0x1e   :  { %284 = vmatprep.subr.bf16.mxu0 %v755_v1  ;;  %325 = vmatprep.subr.bf16.mxu1 %v757_v2  ;;  %v761_v5 = vld [vmem:[#allocation5 + $0xc4] ss:$16 sps:$4 sm:$0xff]   ;;  %v763_v6 = vld [vmem:[#allocation5 + $0xcc] ss:$16 sps:$4 sm:$0xff]   ;;  %v765_v7 = vld [vmem:[#allocation5 + $0xc0] ss:$16 sps:$4 sm:$0xff]  }
  0x1f   :  { %285 = vmatpush1.bf16.msra.mxu0 %v759_v3  ;;  %326 = vmatpush1.bf16.msra.mxu1 %v760_v4  ;;  %v766_v8 = vld [vmem:[#allocation5 + $0xc8] ss:$16 sps:$4 sm:$0xff]   ;;  %v767_v9 = vld [vmem:[#allocation5 + $0xa4] ss:$16 sps:$4 sm:$0xff]   ;;  %v769_v10 = vld [vmem:[#allocation5 + $0xac] ss:$16 sps:$4 sm:$0xff]  }
  0x20   :  { %286 = vmatprep.subr.bf16.mxu0 %v761_v5  ;;  %327 = vmatprep.subr.bf16.mxu1 %v763_v6  ;;  %v771_v11 = vld [vmem:[#allocation5 + $0xa0] ss:$16 sps:$4 sm:$0xff]   ;;  %v772_v12 = vld [vmem:[#allocation5 + $0xa8] ss:$16 sps:$4 sm:$0xff]   ;;  %v773_v13 = vld [vmem:[#allocation5 + $0x84] ss:$16 sps:$4 sm:$0xff]  }
  0x21   :  { %v775_v14 = vld [vmem:[#allocation5 + $0x8c] ss:$16 sps:$4 sm:$0xff]   ;;  %v777_v15 = vld [vmem:[#allocation5 + $0x80] ss:$16 sps:$4 sm:$0xff]   ;;  %v778_v16 = vld [vmem:[#allocation5 + $0x88] ss:$16 sps:$4 sm:$0xff]  }
  0x22   :  { %v779_v17 = vld [vmem:[#allocation5 + $0x64] ss:$16 sps:$4 sm:$0xff]   ;;  %v781_v18 = vld [vmem:[#allocation5 + $0x6c] ss:$16 sps:$4 sm:$0xff]   ;;  %v783_v19 = vld [vmem:[#allocation5 + $0x60] ss:$16 sps:$4 sm:$0xff]  }
  0x23   :  { %287 = vmatpush1.bf16.msra.mxu0 %v765_v7  ;;  %328 = vmatpush1.bf16.msra.mxu1 %v766_v8  ;;  %v784_v20 = vld [vmem:[#allocation5 + $0x68] ss:$16 sps:$4 sm:$0xff]   ;;  %v785_v21 = vld [vmem:[#allocation5 + $0x44] ss:$16 sps:$4 sm:$0xff]   ;;  %v787_v22 = vld [vmem:[#allocation5 + $0x4c] ss:$16 sps:$4 sm:$0xff]  }
  0x24   :  { %288 = vmatprep.subr.bf16.mxu0 %v767_v9  ;;  %329 = vmatprep.subr.bf16.mxu1 %v769_v10  ;;  %v789_v23 = vld [vmem:[#allocation5 + $0x40] ss:$16 sps:$4 sm:$0xff]   ;;  %v790_v24 = vld [vmem:[#allocation5 + $0x48] ss:$16 sps:$4 sm:$0xff]   ;;  %v791_v25 = vld [vmem:[#allocation5 + $0x24] ss:$16 sps:$4 sm:$0xff]  }
  0x25   :  { %v793_v26 = vld [vmem:[#allocation5 + $0x2c] ss:$16 sps:$4 sm:$0xff]   ;;  %v795_v27 = vld [vmem:[#allocation5 + $0x20] ss:$16 sps:$4 sm:$0xff]   ;;  %v796_v28 = vld [vmem:[#allocation5 + $0x28] ss:$16 sps:$4 sm:$0xff]  }
  0x26   :  { %v797_v29 = vld [vmem:[#allocation5 + $0x4] ss:$16 sps:$4 sm:$0xff]   ;;  %v799_v30 = vld [vmem:[#allocation5 + $0xc] ss:$16 sps:$4 sm:$0xff]   ;;  %v801_v31 = vld [vmem:[#allocation5] ss:$16 sps:$4 sm:$0xff]  }
  0x27   :  { %289 = vmatpush1.bf16.msra.mxu0 %v771_v11  ;;  %330 = vmatpush1.bf16.msra.mxu1 %v772_v12  ;;  %v802_v32 = vld [vmem:[#allocation5 + $0x8] ss:$16 sps:$4 sm:$0xff]   ;;  %v90_v33 = vld [vmem:[%s1002_s1] sm:$0xff]  ;;  %v808_v35 = vld [vmem:[#allocation2 + $0xec] ss:$16 sps:$4 sm:$0xff]   ;;  %s673_s17 = sshll.u32 %s932_s16, 4  ;;  %s674_s17 = int_to_ptr.vmem [resolvable:$true] %s673_s17 }
  0x28   :  { %290 = vmatprep.subr.bf16.mxu0 %v773_v13  ;;  %331 = vmatprep.subr.bf16.mxu1 %v775_v14  ;;  %v805_v34 = vld [vmem:[#allocation2 + $0xe4] ss:$16 sps:$4 sm:$0xff]   ;;  %v91_v36 = vpack.c.bf16 %v90_v33, %v90_v33  ;;  %v803_v37 = vld [vmem:[#allocation2 + $0xe0] ss:$16 sps:$4 sm:$0xff]   ;;  %v806_v38 = vld [vmem:[#allocation2 + $0xe8] ss:$16 sps:$4 sm:$0xff]   ;;  %v610_v13 = vlaneseq  ;;  %p906_p11 = scmp.lt.s32.totalorder %s674_s17, %s674_s17 }
  0x29   :  { %v811_v39 = vld [vmem:[#allocation2 + $0xc4] ss:$16 sps:$4 sm:$0xff]   ;;  %v814_v40 = vld [vmem:[#allocation2 + $0xcc] ss:$16 sps:$4 sm:$0xff]   ;;  %v809_v41 = vld [vmem:[#allocation2 + $0xc0] ss:$16 sps:$4 sm:$0xff]  }
  0x2a   :  { %v812_v42 = vld [vmem:[#allocation2 + $0xc8] ss:$16 sps:$4 sm:$0xff]   ;;  %v817_v43 = vld [vmem:[#allocation2 + $0xa4] ss:$16 sps:$4 sm:$0xff]   ;;  %v820_v44 = vld [vmem:[#allocation2 + $0xac] ss:$16 sps:$4 sm:$0xff]  }
  0x2b   :  { %291 = vmatpush1.bf16.msra.mxu0 %v777_v15  ;;  %332 = vmatpush1.bf16.msra.mxu1 %v778_v16  ;;  %v815_v45 = vld [vmem:[#allocation2 + $0xa0] ss:$16 sps:$4 sm:$0xff]   ;;  %v818_v46 = vld [vmem:[#allocation2 + $0xa8] ss:$16 sps:$4 sm:$0xff]   ;;  %v823_v47 = vld [vmem:[#allocation2 + $0x84] ss:$16 sps:$4 sm:$0xff]  }
  0x2c   :  { %292 = vmatprep.subr.bf16.mxu0 %v779_v17  ;;  %333 = vmatprep.subr.bf16.mxu1 %v781_v18  ;;  %v826_v48 = vld [vmem:[#allocation2 + $0x8c] ss:$16 sps:$4 sm:$0xff]   ;;  %v821_v49 = vld [vmem:[#allocation2 + $0x80] ss:$16 sps:$4 sm:$0xff]   ;;  %v824_v50 = vld [vmem:[#allocation2 + $0x88] ss:$16 sps:$4 sm:$0xff]  }
  0x2d   :  { %v829_v51 = vld [vmem:[#allocation2 + $0x64] ss:$16 sps:$4 sm:$0xff]   ;;  %v832_v52 = vld [vmem:[#allocation2 + $0x6c] ss:$16 sps:$4 sm:$0xff]   ;;  %v827_v53 = vld [vmem:[#allocation2 + $0x60] ss:$16 sps:$4 sm:$0xff]  }
  0x2e   :  { %v830_v54 = vld [vmem:[#allocation2 + $0x68] ss:$16 sps:$4 sm:$0xff]   ;;  %v835_v55 = vld [vmem:[#allocation2 + $0x44] ss:$16 sps:$4 sm:$0xff]   ;;  %v838_v56 = vld [vmem:[#allocation2 + $0x4c] ss:$16 sps:$4 sm:$0xff]  }
  0x2f   :  { %293 = vmatpush1.bf16.msra.mxu0 %v783_v19  ;;  %334 = vmatpush1.bf16.msra.mxu1 %v784_v20  ;;  %v833_v57 = vld [vmem:[#allocation2 + $0x40] ss:$16 sps:$4 sm:$0xff]   ;;  %v836_v58 = vld [vmem:[#allocation2 + $0x48] ss:$16 sps:$4 sm:$0xff]   ;;  %v841_v59 = vld [vmem:[#allocation2 + $0x24] ss:$16 sps:$4 sm:$0xff]  }
  0x30   :  { %294 = vmatprep.subr.bf16.mxu0 %v785_v21  ;;  %335 = vmatprep.subr.bf16.mxu1 %v787_v22  ;;  %v844_v60 = vld [vmem:[#allocation2 + $0x2c] ss:$16 sps:$4 sm:$0xff]   ;;  %v839_v61 = vld [vmem:[#allocation2 + $0x20] ss:$16 sps:$4 sm:$0xff]   ;;  %v842_v62 = vld [vmem:[#allocation2 + $0x28] ss:$16 sps:$4 sm:$0xff]  }
  0x31   :  { %v847_v63 = vld [vmem:[#allocation2 + $0x4] ss:$16 sps:$4 sm:$0xff]   ;;  %v845_v1 = vld [vmem:[#allocation2] ss:$16 sps:$4 sm:$0xff]   ;;  %v848_v2 = vld [vmem:[#allocation2 + $0x8] ss:$16 sps:$4 sm:$0xff]  }
  0x32   :  { %v56_v3 = vld [vmem:[%s1001_s0] sm:$0xff]  ;;  %v611_v14 = vshrl.u32 %v610_v13, 7  ;;  %s901_s18 = scalar_lea.vmem %s674_s17, 128 }
  0x33   :  { %295 = vmatpush1.bf16.msra.mxu0 %v789_v23  ;;  %336 = vmatpush1.bf16.msra.mxu1 %v790_v24  ;;  %v57_v4 = vpack.c.bf16 %v56_v3, %v56_v3  ;;  %v608_v16 = vld [vmem:[%s1006_s5] sm:$0xf]  ;;  %p902_p10 = scmp.ne.s32.totalorder %s674_s17, %s901_s18  ;;  %p907_p12 = scmp.lt.s32.totalorder %s901_s18, %s901_s18 }
  0x34   :  { %296 = vmatprep.subr.bf16.mxu0 %v791_v25  ;;  %337 = vmatprep.subr.bf16.mxu1 %v793_v26  ;;  %v612_v15 = vsub.s32 0, %v611_v14  ;;  %v620_v17 = vsub.s32 2, %v611_v14  ;;  %v616_v18 = vsub.s32 1, %v611_v14 }
  0x35   :  { %p908_p13 = por %p907_p12, %p906_p11 }
  0x36   :  { %v613_v19 = vrot.slane %v608_v16, %v612_v15  ;;  %v621_v24 = vrot.slane %v608_v16, %v620_v17  ;;  %v617_v25 = vrot.slane %v608_v16, %v616_v18 }
  0x37   :  { %297 = vmatpush1.bf16.msra.mxu0 %v795_v27  ;;  %338 = vmatpush1.bf16.msra.mxu1 %v796_v28  ;;  %p909_p0 = pnand %p908_p13, %p902_p10 }
  0x38   :  { %298 = vmatprep.subr.bf16.mxu0 %v797_v29  ;;  %339 = vmatprep.subr.bf16.mxu1 %v799_v30 }
  0x3b   :  { %299 = vmatpush1.bf16.msra.mxu0 %v801_v31  ;;  %340 = vmatpush1.bf16.msra.mxu1 %v802_v32 }
  0x3c   :  { %526 = vmatprep.subr.bf16.mxu0 %v805_v34  ;;  %567 = vmatprep.subr.bf16.mxu1 %v808_v35 }
  0x3e   :  { %317 = vmatmul.mubr.bf16.vlgmr.msra.gmra.mxu0 %v91_v36  ;;  %358 = vmatmul.mubr.bf16.vlgmr.msra.gmra.mxu1 %v91_v36 }
  0x3f   :  { %527 = vmatpush1.bf16.msra.mxu0 %v803_v37  ;;  %568 = vmatpush1.bf16.msra.mxu1 %v806_v38 }
  0x40   :  { %528 = vmatprep.subr.bf16.mxu0 %v811_v39  ;;  %569 = vmatprep.subr.bf16.mxu1 %v814_v40  ;;  %v624_v39 = vsub.s32 3, %v611_v14 }
  0x41   :  { %558 = vmatprep.mubr.bf16.mxu0 %v931_v0  ;;  %599 = vmatprep.mubr.bf16.mxu1 %v931_v0  ;;  %v850_v0 = vld [vmem:[#allocation2 + $0xc] ss:$16 sps:$4 sm:$0xff]  }
  0x43   :  { %529 = vmatpush1.bf16.msra.mxu0 %v809_v41  ;;  %570 = vmatpush1.bf16.msra.mxu1 %v812_v42 }
  0x44   :  { %530 = vmatprep.subr.bf16.mxu0 %v817_v43  ;;  %571 = vmatprep.subr.bf16.mxu1 %v820_v44  ;;  %v625_v43 = vrot.slane %v608_v16, %v624_v39 }
  0x47   :  { %531 = vmatpush1.bf16.msra.mxu0 %v815_v45  ;;  %572 = vmatpush1.bf16.msra.mxu1 %v818_v46 }
  0x48   :  { %532 = vmatprep.subr.bf16.mxu0 %v823_v47  ;;  %573 = vmatprep.subr.bf16.mxu1 %v826_v48 }
  0x4b   :  { %533 = vmatpush1.bf16.msra.mxu0 %v821_v49  ;;  %574 = vmatpush1.bf16.msra.mxu1 %v824_v50 }
  0x4c   :  { %534 = vmatprep.subr.bf16.mxu0 %v829_v51  ;;  %575 = vmatprep.subr.bf16.mxu1 %v832_v52 }
  0x4f   :  { %535 = vmatpush1.bf16.msra.mxu0 %v827_v53  ;;  %576 = vmatpush1.bf16.msra.mxu1 %v830_v54 }
  0x50   :  { %536 = vmatprep.subr.bf16.mxu0 %v835_v55  ;;  %577 = vmatprep.subr.bf16.mxu1 %v838_v56  ;;  %v655_v55 = vld [vmem:[%s1003_s2] sm:$0xff] }
  0x53   :  { %537 = vmatpush1.bf16.msra.mxu0 %v833_v57  ;;  %578 = vmatpush1.bf16.msra.mxu1 %v836_v58 }
  0x54   :  { %538 = vmatprep.subr.bf16.mxu0 %v841_v59  ;;  %579 = vmatprep.subr.bf16.mxu1 %v844_v60 }
  0x57   :  { %539 = vmatpush1.bf16.msra.mxu0 %v839_v61  ;;  %580 = vmatpush1.bf16.msra.mxu1 %v842_v62 }
  0x58   :  { %540 = vmatprep.subr.bf16.mxu0 %v847_v63  ;;  %581 = vmatprep.subr.bf16.mxu1 %v850_v0 }
  0x5b   :  { %541 = vmatpush1.bf16.msra.mxu0 %v845_v1  ;;  %582 = vmatpush1.bf16.msra.mxu1 %v848_v2 }
  0x5e   :  { %559 = vmatmul.mubr.bf16.vlgmr.msra.gmra.mxu0 %v57_v4  ;;  %600 = vmatmul.mubr.bf16.vlgmr.msra.gmra.mxu1 %v57_v4 }
  0xfe   :  { %v318_v5 = vpop.f32.mrf.mxu0  ;;  %v359_v6 = vpop.f32.mrf.mxu1 }
 0x100   :  { %v320_v7 = vpop.f32.mrf.mxu0  ;;  %v361_v8 = vpop.f32.mrf.mxu1 }
 0x102   :  { %v322_v9 = vpop.f32.mrf.mxu0  ;;  %v363_v10 = vpop.f32.mrf.mxu1 }
 0x104   :  { %v323_v11 = vpop.f32.mrf.mxu0  ;;  %v364_v12 = vpop.f32.mrf.mxu1 }
 0x11e   :  { %v560_v20 = vpop.f32.mrf.mxu0  ;;  %v601_v21 = vpop.f32.mrf.mxu1 }
 0x11f   :  { %v561_v22 = vadd.f32 %v560_v20, %v318_v5  ;;  %v602_v23 = vadd.f32 %v601_v21, %v359_v6 }
 0x120   :  { %v562_v26 = vpop.f32.mrf.mxu0  ;;  %v603_v27 = vpop.f32.mrf.mxu1 }
 0x121   :  { %v630_v28 = vadd.f32 %v613_v19, %v561_v22  ;;  %v563_v29 = vadd.f32 %v562_v26, %v320_v7  ;;  %v632_v33 = vadd.f32 %v621_v24, %v602_v23  ;;  %v604_v42 = vadd.f32 %v603_v27, %v361_v8 }
 0x122   :  { %v564_v30 = vpop.f32.mrf.mxu0  ;;  %v605_v31 = vpop.f32.mrf.mxu1 }
 0x123   :  { %v634_v32 = vpack.c.bf16 %v630_v28, %v630_v28  ;;  %v631_v34 = vadd.f32 %v617_v25, %v563_v29  ;;  %v646_v40 = vpack.c.bf16 %v632_v33, %v632_v33  ;;  %v633_v44 = vadd.f32 %v625_v43, %v604_v42 }
 0x124   :  { %v565_v35 = vpop.f32.mrf.mxu0  ;;  %v606_v36 = vpop.f32.mrf.mxu1 }
 0x125   :  { %v635_v37 = vmul.bf16 1056980736, %v634_v32  ;;  %v640_v38 = vpack.c.bf16 %v631_v34, %v631_v34  ;;  %v649_v45 = vpack.c.bf16 %v633_v44, %v633_v44 }
 0x127   :  { %851 = vtanh.bf16 %v635_v37  ;;  %v641_v41 = vmul.bf16 1056980736, %v640_v38  ;;  %v650_v48 = vmul.bf16 1056980736, %v649_v45 }
 0x129   :  { %853 = vtanh.bf16 %v641_v41 }
 0x12a   :  { %855 = vtanh.bf16 %v646_v40 }
 0x12b   :  { %857 = vtanh.bf16 %v650_v48 }
 0x135   :  { %v852_v46 = vpop.eup %851 }
 0x136   :  { %v637_v47 = vmul.bf16 1056980736, %v852_v46 }
 0x137   :  { %v854_v49 = vpop.eup %853 }
 0x138   :  { %v643_v50 = vmul.bf16 1056980736, %v854_v49  ;;  %v638_v51 = vadd.bf16 1056980736, %v637_v47  ;;  %v856_v52 = vpop.eup %855 }
 0x139   :  { %v648_v56 = vunpack.c.l.bf16 %v856_v52 }
 0x13a   :  { %v639_v53 = vunpack.c.l.bf16 %v638_v51  ;;  %v644_v54 = vadd.bf16 1056980736, %v643_v50 }
 0x13c   :  { %v645_v57 = vunpack.c.l.bf16 %v644_v54  ;;  %v657_v59 = vmul.f32 %v648_v56, %v639_v53 }
 0x13e   :  { %v656_v58 = vmul.f32 %v655_v55, %v645_v57 }
 0x140   :  { %v658_v60 = vadd.f32 %v657_v59, %v656_v58 }
 0x142   :  { %v659_v61 = vpack.c.bf16 %v658_v60, %v658_v60  ;;  %664 = vst [vmem:[#allocation7] sm:$0xff] %v658_v60 }
 0x143   :  { %912 = shalt.err (!%p909_p0)
}
 0x144   :  { %676 = dma.vmem_to_hbm [thread:$0]  %s674_s17, 128, %s1008_s7, [#allocation4]   ;;  %859 = vtanh.bf16 %v659_v61  ;;  %v858_v62 = vpop.eup %857 }
 0x145   :  { %v652_v63 = vmul.bf16 1056980736, %v858_v62 }
 0x147   :  { %v653_v0 = vadd.bf16 1056980736, %v652_v63 }
 0x149   :  { %v654_v2 = vunpack.c.l.bf16 %v653_v0 }
 0x152   :  { %v860_v1 = vpop.eup %859 }
 0x153   :  { %v661_v3 = vunpack.c.l.bf16 %v860_v1 }
 0x155   :  { %v662_v4 = vmul.f32 %v661_v3, %v654_v2 }
 0x157   :  { %663 = vst [vmem:[%s1007_s6] sm:$0xff] %v662_v4 }
 0x158   :  { %925 = dma.done.wait [#allocation4], 128  }
 0x159   :  { %926 = vsyncadd [#allocation4], 4294967168 }
 0x15a   :  { %682 = vsyncpa [#allocation3], 1 }
 0x15b   :  { %683 = vsyncpa [#allocation6], 1 }
 0x15c   :  { %684 = vsyncpa [#allocation4], 1 }

</bundles_post_ra>
